<compile_context>
chip_gen: v7x
topology: tpu7x:2x2x1
jax: 0.10.0
libtpu: 0.0.40
codegen_flags: <defaults>
</compile_context>

<pallas_src>
import functools
import math

import jax
import jax.numpy as jnp
from jax.experimental import pallas as pl
from jax.experimental.pallas import tpu as pltpu


_TARGET_BUF_BYTES = 4 * 1024 * 1024      # per-buffer tile target (2–8 MiB range)


def _vmem_budgets():
    """(vmem_limit_bytes, tile budget) — modest, per perf review."""
    cap = None
    try:
        cap = getattr(pltpu.get_tpu_info(), "vmem_capacity_bytes", None)
    except Exception:
        cap = None
    if not cap:
        cap = 64 * 1024 * 1024            # conservative fallback (v7x per-TC VMEM)
    vmem_limit = min(48 * 1024 * 1024, int(cap) * 3 // 4)
    tile_budget = max(vmem_limit - 8 * 1024 * 1024, vmem_limit // 2)
    return vmem_limit, tile_budget


def _channel_gate(pooled, w_ref, c):
    """sigmoid(conv1d_k over channels) for pooled (TR, 1) f32.

    Requires TR % c == 0 and image-aligned tiles (row-block starts are
    multiples of c), so the channel index of row r is r % c.  Taps that fall
    outside a row's own image (including into ragged-garbage rows) are zeroed
    by the validity mask, which reproduces the Conv1d zero padding.
    This is O(TR) work — negligible next to the HBM-bound tile.
    """
    tr = pooled.shape[0]
    k = w_ref.shape[0]
    pad = (k - 1) // 2
    c_local = jax.lax.broadcasted_iota(jnp.int32, (tr, 1), 0) % c
    if pad > 0:
        zeros = jnp.zeros((pad, 1), jnp.float32)
        padded = jnp.concatenate([zeros, pooled, zeros], axis=0)   # (TR+2*pad, 1)
    else:
        padded = pooled
    y = jnp.zeros_like(pooled)
    for j in range(k):                      # k is tiny & static -> unrolled
        off = j - pad
        shifted = padded[j:j + tr]          # pooled[r + off], zeros off tile ends
        valid = jnp.logical_and(c_local + off >= 0, c_local + off < c)
        y = y + jnp.where(valid, w_ref[j] * shifted, 0.0)
    return jax.nn.sigmoid(y)                # (TR, 1) f32


# ---------------- Path A: fused single pass (1 read + 1 write of x) ----------
def _eca_fused_kernel(w_ref, x_ref, o_ref, *, c, hw):
    # w_ref: SMEM (k,) f32 ; x_ref/o_ref: VMEM (TR, HW) native dtype.
    # Read x_ref twice: the f32 upcast is only live for the pooled reduction,
    # and the multiply runs in the native dtype (halves vreg pressure for bf16).
    pooled = jnp.sum(x_ref[...].astype(jnp.float32), axis=1, keepdims=True) \
        * (1.0 / hw)
    gate = _channel_gate(pooled, w_ref, c)                    # (TR, 1) f32
    o_ref[...] = x_ref[...] * gate.astype(o_ref.dtype)


# ---------------- Path B pass 1: HW-tiled pool + conv + sigmoid --------------
def _eca_pool_gate_kernel(w_ref, x_ref, g_ref, acc_ref, *, c, hw, thw,
                          need_lane_mask):
    j = pl.program_id(1)

    @pl.when(j == 0)
    def _():
        acc_ref[...] = jnp.zeros_like(acc_ref)

    x = x_ref[...].astype(jnp.float32)
    if need_lane_mask:        # static: only emitted when hw % thw != 0
        lane = jax.lax.broadcasted_iota(jnp.int32, x.shape, 1) + j * thw
        x = jnp.where(lane < hw, x, 0.0)
    acc_ref[...] += jnp.sum(x, axis=1, keepdims=True)

    @pl.when(j == pl.num_programs(1) - 1)
    def _():
        g_ref[...] = _channel_gate(acc_ref[...] * (1.0 / hw), w_ref, c)


# ---------------- Path B pass 2: fully tiled elementwise apply ---------------
def _eca_apply_kernel(x_ref, g_ref, o_ref):
    o_ref[...] = x_ref[...] * g_ref[...].astype(o_ref.dtype)


def eca_layer_pallas(x_nchw, conv_w, *, max_tile_bytes=None, donate_input=True):
    """x_nchw: (N, C, H, W) float; conv_w: Conv1d(1,1,k,bias=False) weight."""
    n, c, h, w = x_nchw.shape
    hw = h * w
    rows = n * c
    conv_w = jnp.asarray(conv_w, jnp.float32).reshape(-1)    # (1,1,k) -> (k,)
    dtype = x_nchw.dtype
    itemsize = jnp.dtype(dtype).itemsize

    vmem_limit, tile_budget = _vmem_budgets()
    if max_tile_bytes is not None:                # test hook / manual override
        tile_budget = min(tile_budget, max_tile_bytes)

    # Dtype-aware sublane packing: 8 rows (f32) / 16 (bf16) / 32 (int8/fp8).
    sub = max(8, 32 // itemsize)
    nb_unit = sub // math.gcd(c, sub)             # images per row-aligned unit
    unit_rows = nb_unit * c
    n_units = pl.cdiv(n, nb_unit)

    x2 = x_nchw.reshape(rows, hw)                 # no pad, no copy

    make_cparams = functools.partial(pltpu.CompilerParams,
                                     vmem_limit_bytes=vmem_limit)

    # Path-A per-unit footprint: (in + out) x double-buffer in the native
    # dtype plus one transient f32 tile for the pooled-sum upcast.
    unit_bytes = unit_rows * hw * itemsize
    unit_cost = 4 * unit_bytes + unit_rows * hw * 4

    if unit_cost <= tile_budget:
        # ------------------------------ Path A ------------------------------
        units_by_target = max(1, _TARGET_BUF_BYTES // unit_bytes)
        units_by_budget = max(1, tile_budget // unit_cost)
        units = min(units_by_target, units_by_budget, n_units)
        if n_units >= 4:                  # keep >= ~4 grid steps for pipelining
            units = min(units, pl.cdiv(n_units, 4))
        units = max(units, 1)
        tr = units * nb_unit * c
        if tr >= rows:
            tr = rows                     # full-dim row block (always legal)
        assert tr % c == 0                # gate logic needs image-aligned tiles
        grid0 = pl.cdiv(rows, tr)

        alias = {"input_output_aliases": {1: 0}} if donate_input else {}
        out = pl.pallas_call(
            functools.partial(_eca_fused_kernel, c=c, hw=hw),
            out_shape=jax.ShapeDtypeStruct((rows, hw), dtype),
            grid_spec=pltpu.PrefetchScalarGridSpec(
                num_scalar_prefetch=0,
                grid=(grid0,),
                in_specs=[
                    pl.BlockSpec(memory_space=pltpu.MemorySpace.SMEM),  # weights
                    pl.BlockSpec((tr, hw), lambda i: (i, 0)),
                ],
                out_specs=pl.BlockSpec((tr, hw), lambda i: (i, 0)),
            ),
            compiler_params=make_cparams(dimension_semantics=("parallel",)),
            cost_estimate=pl.CostEstimate(
                flops=2 * rows * hw,
                transcendentals=rows,
                bytes_accessed=2 * rows * hw * itemsize),
            **alias,
        )(conv_w, x2)
        return out.reshape(n, c, h, w)

    # ------------------------------ Path B ----------------------------------
    # Two passes (1.5x HBM traffic) when even one image-group slab overflows
    # the VMEM budget (large feature maps, e.g. on v7x's 64 MiB VMEM).
    m_rows = max(1, 512 // unit_rows)             # ~512 rows amortizes step cost
    m_rows = min(m_rows, n_units)
    tr = m_rows * unit_rows
    if tr >= rows:
        tr = rows
    assert tr % c == 0
    grid0 = pl.cdiv(rows, tr)

    thw_cap = max(min(_TARGET_BUF_BYTES, tile_budget // 4) // (tr * itemsize), 128)
    thw = max((thw_cap // 128) * 128, 128)
    if thw >= hw:
        thw = hw                                  # full-dim lane block
    grid1 = pl.cdiv(hw, thw)
    need_lane_mask = (hw % thw) != 0              # ragged last lane block

    gate = pl.pallas_call(
        functools.partial(_eca_pool_gate_kernel, c=c, hw=hw, thw=thw,
                          need_lane_mask=need_lane_mask),
        out_shape=jax.ShapeDtypeStruct((rows, 1), jnp.float32),
        grid_spec=pltpu.PrefetchScalarGridSpec(
            num_scalar_prefetch=0,
            grid=(grid0, grid1),
            in_specs=[
                pl.BlockSpec(memory_space=pltpu.MemorySpace.SMEM),
                pl.BlockSpec((tr, thw), lambda i, j: (i, j)),
            ],
            out_specs=pl.BlockSpec((tr, 1), lambda i, j: (i, 0)),
            scratch_shapes=[pltpu.VMEM((tr, 1), jnp.float32)],
        ),
        compiler_params=make_cparams(
            dimension_semantics=("parallel", "arbitrary")),
        cost_estimate=pl.CostEstimate(
            flops=rows * hw,
            transcendentals=rows,
            bytes_accessed=rows * hw * itemsize),
    )(conv_w, x2)
    # TODO(synk): for c >= 128 a lane-dense (N, C) gate layout would avoid the
    # masked 1-lane gate stores; left as-is since the gate is tiny.

    alias = {"input_output_aliases": {0: 0}} if donate_input else {}
    out = pl.pallas_call(
        _eca_apply_kernel,
        out_shape=jax.ShapeDtypeStruct((rows, hw), dtype),
        grid_spec=pltpu.PrefetchScalarGridSpec(
            num_scalar_prefetch=0,
            grid=(grid0, grid1),
            in_specs=[
                pl.BlockSpec((tr, thw), lambda i, j: (i, j)),
                pl.BlockSpec((tr, 1), lambda i, j: (i, 0)),
            ],
            out_specs=pl.BlockSpec((tr, thw), lambda i, j: (i, j)),
        ),
        compiler_params=make_cparams(
            dimension_semantics=("parallel", "parallel")),
        cost_estimate=pl.CostEstimate(
            flops=rows * hw,
            transcendentals=0,
            bytes_accessed=2 * rows * hw * itemsize + rows * 4),
        **alias,
    )(x2, gate)
    return out.reshape(n, c, h, w)


def _eca_reference(x_nchw, conv_w):
    # Pure-JAX reference mirroring the PyTorch module (f32).
    n, c, h, w = x_nchw.shape
    conv_w = jnp.asarray(conv_w, jnp.float32).reshape(-1)
    k = conv_w.shape[0]
    pad = (k - 1) // 2
    pooled = jnp.mean(x_nchw.astype(jnp.float32), axis=(2, 3))     # (N, C)
    pooled_p = jnp.pad(pooled, ((0, 0), (pad, pad)))
    y = jnp.zeros_like(pooled)
    for j in range(k):
        y = y + conv_w[j] * pooled_p[:, j:j + c]
    gate = jax.nn.sigmoid(y)[:, :, None, None]
    return x_nchw.astype(jnp.float32) * gate


if __name__ == "__main__":
    key = jax.random.PRNGKey(0)
    kx, kw, kx2 = jax.random.split(key, 3)

    K_SIZE = 3
    conv_w = jax.random.normal(kw, (K_SIZE,), dtype=jnp.float32) * 0.5

    # (1) Path A, canonical small shape.
    x = jax.random.normal(kx, (2, 4, 16, 16), dtype=jnp.float32)
    x_bf16 = x.astype(jnp.bfloat16)
    ref = _eca_reference(x, conv_w)
    out_a = jax.block_until_ready(eca_layer_pallas(x, conv_w))
    assert out_a.shape == x.shape and out_a.dtype == x.dtype
    assert jnp.allclose(out_a, ref, atol=1e-5, rtol=1e-5), "Path A mismatch"

    # (2) Path A with ragged row tiles + non-multiple-of-128 spatial extent
    #     (no wrapper-side padding anywhere).
    x_r = jax.random.normal(kx2, (10, 4, 10, 10), dtype=jnp.float32)
    ref_r = _eca_reference(x_r, conv_w)
    out_r = jax.block_until_ready(eca_layer_pallas(x_r, conv_w))
    assert jnp.allclose(out_r, ref_r, atol=1e-5, rtol=1e-5), "ragged mismatch"

    # (3) Path B (two-pass, HW-tiled) forced via a tiny tile budget; hw=200
    #     exercises the ragged-lane mask in the pooled sum.
    x_b = jax.random.normal(kx, (2, 4, 10, 20), dtype=jnp.float32)
    ref_b = _eca_reference(x_b, conv_w)
    out_b = jax.block_until_ready(
        eca_layer_pallas(x_b, conv_w, max_tile_bytes=8 * 1024))
    assert jnp.allclose(out_b, ref_b, atol=1e-5, rtol=1e-5), "Path B mismatch"

    # (4) bf16 I/O (gate math stays f32 in-kernel; multiply in native dtype).
    out_bf16 = jax.block_until_ready(eca_layer_pallas(x_bf16, conv_w))
    assert out_bf16.dtype == jnp.bfloat16
    assert jnp.allclose(out_bf16.astype(jnp.float32), ref, atol=5e-2, rtol=5e-2), \
        "bf16 mismatch"

    print("KERNEL_OK")
</pallas_src>

<mosaic_0001>
module attributes {stable_mosaic.version = 11 : i64} {
  func.func @_eca_fused_kernel(%arg0: i32, %arg1: memref<3xf32, #tpu.memory_space<smem>>, %arg2: memref<8x256xf32, #tpu.memory_space<vmem>>, %arg3: memref<8x256xf32, #tpu.memory_space<vmem>>) attributes {dimension_semantics = [#tpu.dimension_semantics<parallel>], iteration_bounds = array<i64: 1>, scalar_prefetch = 0 : i64, scratch_operands = 0 : i64, tpu.core_type = #tpu.core_type<tc>, window_params = [{transform_indices = @transform_0, window_bounds = array<i64: 3>}, {transform_indices = @transform_1, window_bounds = array<i64: 8, 256>}, {transform_indices = @transform_2, window_bounds = array<i64: 8, 256>}]} {
    %c0 = arith.constant 0 : index
    %c0_0 = arith.constant 0 : index
    %0 = vector.load %arg2[%c0, %c0_0] : memref<8x256xf32, #tpu.memory_space<vmem>>, vector<8x256xf32>
    %cst = arith.constant dense<0.000000e+00> : vector<8xf32>
    %1 = vector.multi_reduction <add>, %0, %cst [1] : vector<8x256xf32> to vector<8xf32>
    %2 = vector.shape_cast %1 : vector<8xf32> to vector<8x1xf32>
    %cst_1 = arith.constant 3.906250e-03 : f32
    %3 = vector.broadcast %cst_1 : f32 to vector<8x1xf32>
    %4 = arith.mulf %2, %3 : vector<8x1xf32>
    %5 = tpu.iota {dimensions = array<i32: 0>} : vector<8x1xi32>
    %c4_i32 = arith.constant 4 : i32
    %c0_i32 = arith.constant 0 : i32
    %6 = arith.cmpi eq, %c4_i32, %c0_i32 : i32
    %c1_i32 = arith.constant 1 : i32
    %7 = arith.select %6, %c1_i32, %c4_i32 : i32
    %8 = vector.broadcast %7 : i32 to vector<8x1xi32>
    %9 = arith.remsi %5, %8 : vector<8x1xi32>
    %c0_i32_2 = arith.constant 0 : i32
    %10 = vector.broadcast %c0_i32_2 : i32 to vector<8x1xi32>
    %11 = arith.cmpi ne, %9, %10 : vector<8x1xi32>
    %c0_i32_3 = arith.constant 0 : i32
    %12 = vector.broadcast %c0_i32_3 : i32 to vector<8x1xi32>
    %13 = arith.cmpi slt, %9, %12 : vector<8x1xi32>
    %c0_i32_4 = arith.constant 0 : i32
    %14 = arith.cmpi slt, %7, %c0_i32_4 : i32
    %15 = vector.broadcast %14 : i1 to vector<8x1xi1>
    %16 = vector.broadcast %15 : vector<8x1xi1> to vector<8x1xi1>
    %17 = arith.xori %13, %16 : vector<8x1xi1>
    %18 = arith.andi %17, %11 : vector<8x1xi1>
    %19 = vector.broadcast %7 : i32 to vector<8x1xi32>
    %20 = arith.addi %9, %19 : vector<8x1xi32>
    %21 = arith.select %18, %20, %9 : vector<8x1xi1>, vector<8x1xi32>
    %cst_5 = arith.constant 0.000000e+00 : f32
    %22 = vector.broadcast %cst_5 : f32 to vector<1x1xf32>
    %23 = tpu.concatenate %22, %4, %22 in 0 : vector<1x1xf32>, vector<8x1xf32>, vector<1x1xf32> -> vector<10x1xf32>
    %cst_6 = arith.constant 0.000000e+00 : f32
    %24 = vector.broadcast %cst_6 : f32 to vector<8x1xf32>
    %25 = vector.extract_strided_slice %23 {offsets = [0, 0], sizes = [8, 1], strides = [1, 1]} : vector<10x1xf32> to vector<8x1xf32>
    %c-1_i32 = arith.constant -1 : i32
    %26 = vector.broadcast %c-1_i32 : i32 to vector<8x1xi32>
    %27 = arith.addi %21, %26 : vector<8x1xi32>
    %c0_i32_7 = arith.constant 0 : i32
    %28 = vector.broadcast %c0_i32_7 : i32 to vector<8x1xi32>
    %29 = arith.cmpi sge, %27, %28 : vector<8x1xi32>
    %c-1_i32_8 = arith.constant -1 : i32
    %30 = vector.broadcast %c-1_i32_8 : i32 to vector<8x1xi32>
    %31 = arith.addi %21, %30 : vector<8x1xi32>
    %c4_i32_9 = arith.constant 4 : i32
    %32 = vector.broadcast %c4_i32_9 : i32 to vector<8x1xi32>
    %33 = arith.cmpi slt, %31, %32 : vector<8x1xi32>
    %34 = arith.andi %29, %33 : vector<8x1xi1>
    %c0_10 = arith.constant 0 : index
    %35 = memref.load %arg1[%c0_10] : memref<3xf32, #tpu.memory_space<smem>>
    %36 = vector.broadcast %35 : f32 to vector<8x1xf32>
    %37 = arith.mulf %36, %25 : vector<8x1xf32>
    %cst_11 = arith.constant 0.000000e+00 : f32
    %38 = vector.broadcast %cst_11 : f32 to vector<8x1xf32>
    %39 = arith.select %34, %37, %38 : vector<8x1xi1>, vector<8x1xf32>
    %40 = arith.addf %24, %39 : vector<8x1xf32>
    %41 = vector.extract_strided_slice %23 {offsets = [1, 0], sizes = [8, 1], strides = [1, 1]} : vector<10x1xf32> to vector<8x1xf32>
    %c0_i32_12 = arith.constant 0 : i32
    %42 = vector.broadcast %c0_i32_12 : i32 to vector<8x1xi32>
    %43 = arith.addi %21, %42 : vector<8x1xi32>
    %c0_i32_13 = arith.constant 0 : i32
    %44 = vector.broadcast %c0_i32_13 : i32 to vector<8x1xi32>
    %45 = arith.cmpi sge, %43, %44 : vector<8x1xi32>
    %c0_i32_14 = arith.constant 0 : i32
    %46 = vector.broadcast %c0_i32_14 : i32 to vector<8x1xi32>
    %47 = arith.addi %21, %46 : vector<8x1xi32>
    %c4_i32_15 = arith.constant 4 : i32
    %48 = vector.broadcast %c4_i32_15 : i32 to vector<8x1xi32>
    %49 = arith.cmpi slt, %47, %48 : vector<8x1xi32>
    %50 = arith.andi %45, %49 : vector<8x1xi1>
    %c1 = arith.constant 1 : index
    %51 = memref.load %arg1[%c1] : memref<3xf32, #tpu.memory_space<smem>>
    %52 = vector.broadcast %51 : f32 to vector<8x1xf32>
    %53 = arith.mulf %52, %41 : vector<8x1xf32>
    %cst_16 = arith.constant 0.000000e+00 : f32
    %54 = vector.broadcast %cst_16 : f32 to vector<8x1xf32>
    %55 = arith.select %50, %53, %54 : vector<8x1xi1>, vector<8x1xf32>
    %56 = arith.addf %40, %55 : vector<8x1xf32>
    %57 = vector.extract_strided_slice %23 {offsets = [2, 0], sizes = [8, 1], strides = [1, 1]} : vector<10x1xf32> to vector<8x1xf32>
    %c1_i32_17 = arith.constant 1 : i32
    %58 = vector.broadcast %c1_i32_17 : i32 to vector<8x1xi32>
    %59 = arith.addi %21, %58 : vector<8x1xi32>
    %c0_i32_18 = arith.constant 0 : i32
    %60 = vector.broadcast %c0_i32_18 : i32 to vector<8x1xi32>
    %61 = arith.cmpi sge, %59, %60 : vector<8x1xi32>
    %c1_i32_19 = arith.constant 1 : i32
    %62 = vector.broadcast %c1_i32_19 : i32 to vector<8x1xi32>
    %63 = arith.addi %21, %62 : vector<8x1xi32>
    %c4_i32_20 = arith.constant 4 : i32
    %64 = vector.broadcast %c4_i32_20 : i32 to vector<8x1xi32>
    %65 = arith.cmpi slt, %63, %64 : vector<8x1xi32>
    %66 = arith.andi %61, %65 : vector<8x1xi1>
    %c2 = arith.constant 2 : index
    %67 = memref.load %arg1[%c2] : memref<3xf32, #tpu.memory_space<smem>>
    %68 = vector.broadcast %67 : f32 to vector<8x1xf32>
    %69 = arith.mulf %68, %57 : vector<8x1xf32>
    %cst_21 = arith.constant 0.000000e+00 : f32
    %70 = vector.broadcast %cst_21 : f32 to vector<8x1xf32>
    %71 = arith.select %66, %69, %70 : vector<8x1xi1>, vector<8x1xf32>
    %72 = arith.addf %56, %71 : vector<8x1xf32>
    %73 = arith.negf %72 : vector<8x1xf32>
    %74 = math.exp %73 : vector<8x1xf32>
    %cst_22 = arith.constant 1.000000e+00 : f32
    %75 = vector.broadcast %cst_22 : f32 to vector<8x1xf32>
    %76 = arith.addf %75, %74 : vector<8x1xf32>
    %77 = arith.divf %75, %76 : vector<8x1xf32>
    %c0_23 = arith.constant 0 : index
    %c0_24 = arith.constant 0 : index
    %78 = vector.load %arg2[%c0_23, %c0_24] : memref<8x256xf32, #tpu.memory_space<vmem>>, vector<8x256xf32>
    %79 = vector.broadcast %77 : vector<8x1xf32> to vector<8x256xf32>
    %80 = arith.mulf %78, %79 : vector<8x256xf32>
    %c0_25 = arith.constant 0 : index
    %c0_26 = arith.constant 0 : index
    %81 = vector.load %arg3[%c0_25, %c0_26] : memref<8x256xf32, #tpu.memory_space<vmem>>, vector<8x256xf32>
    tpu.vector_store %arg3[%c0_25, %c0_26], %80 {strides = array<i32>} : memref<8x256xf32, #tpu.memory_space<vmem>>, vector<8x256xf32>,
    return
  }
  func.func @transform_0(%arg0: i32) -> i32 {
    %c0_i32 = arith.constant 0 : i32
    %c0_i32_0 = arith.constant 0 : i32
    return %c0_i32 : i32
  }
  func.func @transform_1(%arg0: i32) -> (i32, i32) {
    %c0_i32 = arith.constant 0 : i32
    %c0_i32_0 = arith.constant 0 : i32
    return %arg0, %c0_i32 : i32, i32
  }
  func.func @transform_2(%arg0: i32) -> (i32, i32) {
    %c0_i32 = arith.constant 0 : i32
    %c0_i32_0 = arith.constant 0 : i32
    return %arg0, %c0_i32 : i32, i32
  }
}

</mosaic_0001>

<bundles_post_ra>
// kernel: tpu_custom_call.1
= control target key start
LH: loop header
LB: loop body
LE: loop exit
PB: predicated region body
PF: predicated region fallthrough
CT: control target
= control target key end

     0   :  { %7 = vsyncpa [#allocation5], 0  ;;  %s256_s0 = inlined_call_operand.vmem [shape: f32[3], index: 0, kind: input, shape index: {}]   ;;  %s257_s1 = inlined_call_operand.hbm [shape: f32[8,256], index: 1, kind: input, shape index: {}, may-alias: {1,2}]   ;;  %s258_s2 = inlined_call_operand.hbm [shape: f32[8,256], index: 2, kind: output, shape index: {}, may-alias: {1,2}]  }
   0x1   :  { %8 = vsyncpa [#allocation3], 0 }
   0x2   :  { %9 = vsyncpa [#allocation4], 0  ;;  %s16_s11 = sshll.u32 %s256_s0, 4  ;;  %s17_s11 = int_to_ptr.vmem [resolvable:$true] %s16_s11 }
   0x3   :  { %s148_s12 = scalar_lea.vmem %s17_s11, 16  ;;  %p153_p1 = scmp.lt.s32.totalorder %s17_s11, %s17_s11 }
   0x4   :  { %p149_p0 = scmp.ne.s32.totalorder %s17_s11, %s148_s12  ;;  %p154_p2 = scmp.lt.s32.totalorder %s148_s12, %s148_s12 }
   0x6   :  { %p155_p3 = por %p154_p2, %p153_p1 }
   0x8   :  { %p156_p4 = pnand %p155_p3, %p149_p0 }
   0xa   :  { %159 = shalt.err (!%p156_p4)
}
   0xb   :  { %s210_s13 = smov [#allocation2]   ;;  %s211_s14 = smov [#allocation6]  }
   0xc   :  { %19 = dma.vmem_to_smem %s17_s11, 16, %s210_s13, [#allocation5]  }
   0xd   :  { %s26_s15 = sshll.u32 %s211_s14, 4  ;;  %s160_s18 = scalar_lea.hbm %s257_s1, 256  ;;  %s27_s15 = int_to_ptr.vmem [resolvable:$true] %s26_s15 }
   0xe   :  { %p161_p5 = scmp.ne.s32.totalorder %s257_s1, %s160_s18  ;;  %p164_p6 = scmp.lt.u32.totalorder %s160_s18, %s257_s1 }
  0x10   :  { %p166_p7 = pnand %p164_p6, %p161_p5 }
  0x12   :  { %169 = shalt.err (!%p166_p7)
}
  0x13   :  { %s170_s22 = scalar_lea.vmem %s27_s15, 256  ;;  %p175_p9 = scmp.lt.s32.totalorder %s27_s15, %s27_s15 }
  0x14   :  { %p171_p8 = scmp.ne.s32.totalorder %s27_s15, %s170_s22  ;;  %p176_p10 = scmp.lt.s32.totalorder %s170_s22, %s170_s22 }
  0x16   :  { %p177_p11 = por %p176_p10, %p175_p9 }
  0x18   :  { %p178_p12 = pnand %p177_p11, %p171_p8 }
  0x1a   :  { %181 = shalt.err (!%p178_p12)
}
  0x1b   :  { %29 = dma.hbm_to_vmem [thread:$0]  %s257_s1, 256, %s27_s15, [#allocation3]  }
  0x1c   :  { %204 = dma.done.wait [#allocation5], 16  }
  0x1d   :  { %205 = vsyncadd [#allocation5], 4294967280 }
  0x1e   :  { %206 = dma.done.wait [#allocation3], 256  }
  0x1f   :  { %207 = vsyncadd [#allocation3], 4294967040 }
  0x20   :  { %36 = sfence }
  0x21   :  { %v37_v0 = vld [vmem:[#allocation6] sm:$0xff]  ;;  %v38_v1 = vld [vmem:[#allocation6 + $0x8] sm:$0xff]  ;;  %v212_v3 = vmov 0   ;;  %v43_v4 = vlaneseq  ;;  %s67_s25 = sld [smem:[#allocation2]]  ;;  %s136_s26 = sld [smem:[#allocation2 + $0x1]]  ;;  %vm60_vm0 = vcmask 1040384  }
  0x22   :  { %v39_v2 = vadd.f32 %v38_v1, %v37_v0  ;;  %143 = vset.pattern.permute.xlu0 %v212_v3  ;;  %s137_s27 = sld [smem:[#allocation2 + $0x2]]  ;;  %vm81_vm2 = vcmask 1046528   ;;  %vm98_vm3 = vcmask 1045504   ;;  %s213_s1 = smov [#allocation7]  }
  0x23   :  { %v44_v5 = vshrl.u32 %v43_v4, 7  ;;  %s126_s28 = sshll.u32 %s213_s1, 4  ;;  %s127_s28 = int_to_ptr.vmem [resolvable:$true] %s126_s28 }
  0x24   :  { %40 = vadd.xlane.f32.xlu0 %v39_v2  ;;  %s182_s29 = scalar_lea.vmem %s127_s28, 256  ;;  %p187_p0 = scmp.lt.s32.totalorder %s127_s28, %s127_s28 }
  0x25   :  { %v49_v6 = vand.u32 3, %v44_v5  ;;  %p183_p13 = scmp.ne.s32.totalorder %s127_s28, %s182_s29  ;;  %p188_p1 = scmp.lt.s32.totalorder %s182_s29, %s182_s29 }
  0x27   :  { %v63_v9 = vadd.s32 4294967295, %v49_v6  ;;  %v68_v10 = vstv %s67_s25  ;;  %v76_v11 = vstv %s136_s26  ;;  %v88_v14 = vadd.s32 1, %v49_v6  ;;  %p189_p2 = por %p188_p1, %p187_p0 }
  0x28   :  { %v93_v12 = vstv %s137_s27 }
  0x29   :  { %vm64_vm1 = vcmp.ge.s32.totalorder %v63_v9, 0  ;;  %vm90_vm4 = vcmp.lt.s32.totalorder %v88_v14, 4  ;;  %p190_p3 = pnand %p189_p2, %p183_p13 }
  0xb1   :  { %v41_v7 = vpop.xlane.xlu0 %40 }
  0xb2   :  { %v42_v8 = vmul.f32 0.00390625, %v41_v7 }
  0xb4   :  { %v58_v13 = vrot.slane %v42_v8, 7 }
  0xb6   :  { %v61_v15 = vsel %vm60_vm0, 0.0, %v58_v13  ;;  %v62_v16 = vsel %vm60_vm0, %v58_v13, 0.0 }
  0xb7   :  { %v69_v17 = vmul.f32 %v68_v10, %v61_v15  ;;  %v77_v18 = vmul.f32 %v76_v11, %v61_v15  ;;  %v78_v19 = vmul.f32 %v76_v11, %v62_v16  ;;  %v94_v20 = vmul.f32 %v93_v12, %v61_v15 }
  0xb8   :  { %v95_v21 = vmul.f32 %v93_v12, %v62_v16 }
  0xb9   :  { %v82_v22 = vrot.slane %v77_v18, 1  ;;  %v83_v23 = vrot.slane %v78_v19, 1  ;;  %v99_v24 = vrot.slane %v94_v20, 2  ;;  %v70_v26 = vsel %vm64_vm1, %v69_v17, 0.0 }
  0xba   :  { %v100_v25 = vrot.slane %v95_v21, 2 }
  0xbb   :  { %v84_v27 = vsel %vm81_vm2, %v82_v22, %v83_v23 }
  0xbc   :  { %v87_v28 = vadd.f32 %v84_v27, %v70_v26  ;;  %v101_v29 = vsel %vm98_vm3, %v99_v24, %v100_v25 }
  0xbd   :  { %v103_v30 = vsel %vm90_vm4, %v101_v29, 0.0 }
  0xbe   :  { %v104_v31 = vadd.f32 %v103_v30, %v87_v28 }
  0xc0   :  { %v138_v32 = vmul.f32 -1.442695, %v104_v31 }
  0xc2   :  { %144 = vpow2.f32 %v138_v32 }
  0xcc   :  { %v145_v33 = vpop.eup %144 }
  0xcd   :  { %v108_v34 = vadd.f32 1.0, %v145_v33 }
  0xcf   :  { %146 = vrcp.f32 %v108_v34 }
  0xd9   :  { %v147_v35 = vpop.eup %146 }
  0xda   :  { %113 = vperm.xlu0 %143, %v147_v35  }
 0x159   :  { %v114_v36 = vpop.permute.xlu0 %113 }
 0x15a   :  { %v116_v37 = vmul.f32 %v114_v36, %v37_v0  ;;  %v117_v38 = vmul.f32 %v114_v36, %v38_v1 }
 0x15c   :  { %118 = vst [vmem:[#allocation7] sm:$0xff] %v116_v37  ;;  %119 = vst [vmem:[#allocation7 + $0x8] sm:$0xff] %v117_v38 }
 0x15d   :  { %193 = shalt.err (!%p190_p3)
}
 0x15e   :  { %s194_s4 = scalar_lea.hbm %s258_s2, 256 }
 0x15f   :  { %p195_p4 = scmp.ne.s32.totalorder %s258_s2, %s194_s4  ;;  %p198_p5 = scmp.lt.u32.totalorder %s194_s4, %s258_s2 }
 0x161   :  { %p200_p6 = pnand %p198_p5, %p195_p4 }
 0x163   :  { %203 = shalt.err (!%p200_p6)
}
 0x164   :  { %129 = dma.vmem_to_hbm [thread:$0]  %s127_s28, 256, %s258_s2, [#allocation4]  }
 0x165   :  { %208 = dma.done.wait [#allocation4], 256  }
 0x166   :  { %209 = vsyncadd [#allocation4], 4294967040 }
 0x167   :  { %133 = vsyncpa [#allocation3], 1 }
 0x168   :  { %134 = vsyncpa [#allocation4], 1 }
 0x169   :  { %135 = vsyncpa [#allocation5], 1 }

</bundles_post_ra>
